<compile_context>
chip_gen: v7x
topology: tpu7x:2x2x1
jax: 0.10.0
libtpu: 0.0.40
codegen_flags: <defaults>
</compile_context>

<pallas_src>
import functools
import math

import jax
import jax.numpy as jnp
from jax.experimental import pallas as pl
from jax.experimental.pallas import tpu as pltpu

_LANE = 128
_SUBLANE = 8
# Combined (input tile + output tile) VMEM bytes per grid step. Double-buffered
# pipeline -> live VMEM ~ 2 * _TILE_BYTES + mean row: fits the 32 MiB default
# scoped limit on v5e/v6e/v7x and v7x's 64 MiB physical VMEM with headroom, so
# no vmem_limit_bytes override is needed.
_TILE_BYTES = 8 * 1024 * 1024
# Force at least this many grid steps when rows permit (DMA overlap + balanced
# work for v7x's two TensorCores on the "parallel" row axis).
_MIN_STEPS = 4
# Below this total HBM traffic, plain XLA wins (fusion, no launch/step cost).
_MIN_PALLAS_BYTES = 1024 * 1024
# Cap on the lane-widened width (keeps the tiled mean row tiny).
_MAX_WIDEN = 16384


def _sublane_multiple(itemsize: int) -> int:
    # f32 packs 8 rows/vreg, bf16 16, int8/fp8 32 — keep row tiles aligned so
    # stores stay unmasked and no sublane repacking is needed.
    return _SUBLANE * max(1, 4 // itemsize)


def _zero_mean_kernel(x_ref, mean_ref, o_ref, *, subtract: bool):
    # x_ref: (TR, TW) tile in x's native dtype; mean_ref: (1, TW) out-dtype row;
    # o_ref: (TR, TW) out-dtype tile. In-kernel cast is free (VALU slack) and
    # avoids a separate wrapper-side astype pass over HBM.
    x = x_ref[...].astype(o_ref.dtype)
    m = mean_ref[...]
    o_ref[...] = (x - m) if subtract else (x + m)


def zero_mean_transform(x, mean, shift: str = "subtract", *,
                        use_pallas=None, donate_x: bool = False):
    """Pallas equivalent of ZeroMeanTransform.forward.

    x:    array whose trailing dim == num_features.
    mean: (num_features,) buffer.
    use_pallas: None -> size heuristic; True/False -> force path.
    donate_x: alias output onto x's buffer (only applied when dtypes match;
              true donation also requires caller-side jit donation).
    """
    f = mean.shape[0]
    assert x.shape[-1] == f, "last dim of x must equal num_features"
    subtract = (shift == "subtract")

    # PyTorch promote-then-add/sub semantics (e.g. bf16 x, f32 mean -> f32 out).
    out_dtype = jnp.promote_types(x.dtype, mean.dtype)
    x_item = jnp.dtype(x.dtype).itemsize
    o_item = jnp.dtype(out_dtype).itemsize
    total = x.size

    if use_pallas is None:
        use_pallas = total * (x_item + o_item) >= _MIN_PALLAS_BYTES
    if total == 0 or not use_pallas:
        return (x - mean if subtract else x + mean).astype(out_dtype)

    # ---- Choose a lane-dense 2-D layout (rows, W) for the flattened tensor ----
    if f % _LANE == 0:
        w = f
        mean_row = mean.astype(out_dtype).reshape(1, f)
    else:
        lcm = math.lcm(f, _LANE)
        if total % lcm == 0 and lcm <= _MAX_WIDEN:
            # Widen lanes to a multiple of 128; feature index of lane l is l % f,
            # so mean tiled (w // f) times reproduces the broadcast exactly.
            w = lcm
            mean_row = jnp.tile(mean.astype(out_dtype), w // f).reshape(1, w)
        else:
            # Fallback: w equals the full minor dim (legal BlockSpec); stores are
            # partially masked but correct.
            w = f
            mean_row = mean.astype(out_dtype).reshape(1, f)
    rows = total // w

    # ---- Tile sizes (budgeted against the strictest, v7x, VMEM picture) ----
    sub = max(_sublane_multiple(x_item), _sublane_multiple(o_item))
    item_sum = x_item + o_item
    # Lane-axis block: only split W when a single (sub, w) row-group would blow
    # the per-step budget (huge feature dims) — keeps VMEM bounded on v7x.
    max_w = max(_LANE, (_TILE_BYTES // (sub * item_sum)) // _LANE * _LANE)
    tw = w if w <= max_w else max_w

    row_bytes = tw * item_sum
    tr_budget = max(sub, (_TILE_BYTES // row_bytes) // sub * sub)
    if rows <= sub:
        tr = rows  # full-dim block is always legal
    else:
        # Cap so the grid has >= _MIN_STEPS row steps (pipelining / TC balance).
        tr_steps = max(sub, (pl.cdiv(rows, _MIN_STEPS) // sub) * sub)
        tr = min(tr_budget, tr_steps)

    grid = (pl.cdiv(rows, tr), pl.cdiv(w, tw))  # partial edge blocks are masked

    x2 = x.reshape(rows, w)  # NOTE: no astype here — cast happens in-kernel.
    kernel = functools.partial(_zero_mean_kernel, subtract=subtract)
    alias = {0: 0} if (donate_x and x.dtype == out_dtype) else {}

    out = pl.pallas_call(
        kernel,
        out_shape=jax.ShapeDtypeStruct((rows, w), out_dtype),
        grid=grid,
        in_specs=[
            pl.BlockSpec((tr, tw), lambda i, j: (i, j)),  # streamed x tiles
            pl.BlockSpec((1, tw), lambda i, j: (0, j)),   # mean row (lane-blocked)
        ],
        out_specs=pl.BlockSpec((tr, tw), lambda i, j: (i, j)),
        compiler_params=pltpu.CompilerParams(
            # All tiles are independent -> both axes parallel (v7x 2-TC split;
            # neutral on single-TC v5e/v6e).
            dimension_semantics=("parallel", "parallel"),
        ),
        input_output_aliases=alias,
    )(x2, mean_row)

    return out.reshape(x.shape)


if __name__ == "__main__":
    key = jax.random.PRNGKey(0)
    k1, k2, k3, k4 = jax.random.split(key, 4)

    # Small shape matching typical module usage: (batch, seq, hidden), hidden=32.
    num_features = 32
    x_small = jax.random.normal(k1, (2, 8, num_features), dtype=jnp.float32)
    # __init__ zeros the mean buffer; use a nonzero mean to exercise the broadcast.
    mean_small = jax.random.normal(k2, (num_features,), dtype=jnp.float32)

    # Force the Pallas path (size heuristic would route tiny inputs to XLA).
    out_sub = zero_mean_transform(x_small, mean_small, "subtract", use_pallas=True)
    out_add = zero_mean_transform(x_small, mean_small, "add", use_pallas=True)
    jax.block_until_ready(out_sub)
    jax.block_until_ready(out_add)
    assert out_sub.shape == x_small.shape and out_sub.dtype == x_small.dtype
    assert jnp.allclose(out_sub, x_small - mean_small, atol=1e-6)
    assert jnp.allclose(out_add, x_small + mean_small, atol=1e-6)

    # Mixed precision (bf16 x, f32 mean) exercises the in-kernel cast path.
    x_bf = jax.random.normal(k3, (2, 64, 96), dtype=jnp.bfloat16)
    mean_bf = jnp.linspace(-0.5, 0.5, 96, dtype=jnp.float32)
    out_bf = zero_mean_transform(x_bf, mean_bf, "subtract", use_pallas=True)
    jax.block_until_ready(out_bf)
    assert out_bf.dtype == jnp.float32
    assert jnp.allclose(out_bf, x_bf - mean_bf, atol=1e-6)

    # Moderate shape exercising the multi-step, row-tiled pipelined path.
    f_big = 256
    x_big = jax.random.normal(k4, (4, 1024, f_big), dtype=jnp.float32)
    mean_big = jnp.linspace(-1.0, 1.0, f_big, dtype=jnp.float32)
    out_big = zero_mean_transform(x_big, mean_big, "subtract", use_pallas=True)
    jax.block_until_ready(out_big)
    assert jnp.allclose(out_big, x_big - mean_big, atol=1e-6)

    # TODO(synk): ZeroMeanTransform.update() (running-mean buffer accumulation)
    # is stateful training-time bookkeeping, not part of forward; not ported.
    print("KERNEL_OK")
</pallas_src>

<mosaic_0001>
module attributes {stable_mosaic.version = 11 : i64} {
  func.func @_zero_mean_kernel(%arg0: i32, %arg1: i32, %arg2: memref<4x128xf32, #tpu.memory_space<vmem>>, %arg3: memref<1x128xf32, #tpu.memory_space<vmem>>, %arg4: memref<4x128xf32, #tpu.memory_space<vmem>>) attributes {dimension_semantics = [#tpu.dimension_semantics<parallel>, #tpu.dimension_semantics<parallel>], iteration_bounds = array<i64: 1, 1>, scalar_prefetch = 0 : i64, scratch_operands = 0 : i64, tpu.core_type = #tpu.core_type<tc>, window_params = [{transform_indices = @transform_0, window_bounds = array<i64: 4, 128>}, {transform_indices = @transform_1, window_bounds = array<i64: 1, 128>}, {transform_indices = @transform_2, window_bounds = array<i64: 4, 128>}]} {
    %c0 = arith.constant 0 : index
    %c0_0 = arith.constant 0 : index
    %0 = vector.load %arg2[%c0, %c0_0] : memref<4x128xf32, #tpu.memory_space<vmem>>, vector<4x128xf32>
    %c0_1 = arith.constant 0 : index
    %c0_2 = arith.constant 0 : index
    %1 = vector.load %arg3[%c0_1, %c0_2] : memref<1x128xf32, #tpu.memory_space<vmem>>, vector<1x128xf32>
    %2 = vector.broadcast %1 : vector<1x128xf32> to vector<4x128xf32>
    %3 = arith.subf %0, %2 : vector<4x128xf32>
    %c0_3 = arith.constant 0 : index
    %c0_4 = arith.constant 0 : index
    %4 = vector.load %arg4[%c0_3, %c0_4] : memref<4x128xf32, #tpu.memory_space<vmem>>, vector<4x128xf32>
    tpu.vector_store %arg4[%c0_3, %c0_4], %3 {strides = array<i32>} : memref<4x128xf32, #tpu.memory_space<vmem>>, vector<4x128xf32>,
    return
  }
  func.func @transform_0(%arg0: i32, %arg1: i32) -> (i32, i32) {
    %c0_i32 = arith.constant 0 : i32
    return %arg0, %arg1 : i32, i32
  }
  func.func @transform_1(%arg0: i32, %arg1: i32) -> (i32, i32) {
    %c0_i32 = arith.constant 0 : i32
    %c0_i32_0 = arith.constant 0 : i32
    return %c0_i32, %arg1 : i32, i32
  }
  func.func @transform_2(%arg0: i32, %arg1: i32) -> (i32, i32) {
    %c0_i32 = arith.constant 0 : i32
    return %arg0, %arg1 : i32, i32
  }
}

</mosaic_0001>

<bundles_post_ra>
// kernel: tpu_custom_call.1
= control target key start
LH: loop header
LB: loop body
LE: loop exit
PB: predicated region body
PF: predicated region fallthrough
CT: control target
= control target key end

     0   :  { %7 = vsyncpa [#allocation3], 0  ;;  %s144_s0 = inlined_call_operand.hbm [shape: f32[4,128], index: 0, kind: input, shape index: {}]   ;;  %s145_s1 = inlined_call_operand.vmem [shape: f32[1,128], index: 1, kind: input, shape index: {}]   ;;  %s146_s2 = inlined_call_operand.hbm [shape: f32[4,128], index: 2, kind: output, shape index: {}]  }
   0x1   :  { %8 = vsyncpa [#allocation4], 0  ;;  %s100_s9 = smov [#allocation2]   ;;  %s52_s13 = scalar_lea.hbm %s144_s0, 64 }
   0x2   :  { %s15_s10 = sshll.u32 %s100_s9, 4  ;;  %p53_p0 = scmp.ne.s32.totalorder %s144_s0, %s52_s13  ;;  %s16_s10 = int_to_ptr.vmem [resolvable:$true] %s15_s10 }
   0x3   :  { %p56_p1 = scmp.lt.u32.totalorder %s52_s13, %s144_s0 }
   0x5   :  { %p58_p2 = pnand %p56_p1, %p53_p0 }
   0x7   :  { %61 = shalt.err (!%p58_p2)
}
   0x8   :  { %s62_s18 = scalar_lea.vmem %s16_s10, 64  ;;  %p67_p4 = scmp.lt.s32.totalorder %s16_s10, %s16_s10 }
   0x9   :  { %p63_p3 = scmp.ne.s32.totalorder %s16_s10, %s62_s18  ;;  %p68_p5 = scmp.lt.s32.totalorder %s62_s18, %s62_s18 }
   0xb   :  { %p69_p6 = por %p68_p5, %p67_p4 }
   0xd   :  { %p70_p7 = pnand %p69_p6, %p63_p3 }
   0xf   :  { %73 = shalt.err (!%p70_p7)
}
  0x10   :  { %18 = dma.hbm_to_vmem [thread:$0]  %s144_s0, 64, %s16_s10, [#allocation3]  }
  0x11   :  { %96 = dma.done.wait [#allocation3], 64  }
  0x12   :  { %97 = vsyncadd [#allocation3], 4294967232  ;;  %s101_s21 = smov [#allocation5]   ;;  %v24_v0 = vld [vmem:[#allocation2] sm:$0xf] }
  0x13   :  { %s40_s22 = sshll.u32 %s101_s21, 4  ;;  %v49_v1 = vld [vmem:[%s145_s1] ss:$0 sm:$0xff]  ;;  %s41_s22 = int_to_ptr.vmem [resolvable:$true] %s40_s22 }
  0x14   :  { %v32_v2 = vsub.f32 %v24_v0, %v49_v1  ;;  %s74_s25 = scalar_lea.vmem %s41_s22, 64  ;;  %p79_p9 = scmp.lt.s32.totalorder %s41_s22, %s41_s22 }
  0x15   :  { %p75_p8 = scmp.ne.s32.totalorder %s41_s22, %s74_s25  ;;  %p80_p10 = scmp.lt.s32.totalorder %s74_s25, %s74_s25 }
  0x16   :  { %33 = vst [vmem:[#allocation5] sm:$0xf] %v32_v2 }
  0x17   :  { %p81_p11 = por %p80_p10, %p79_p9 }
  0x19   :  { %p82_p12 = pnand %p81_p11, %p75_p8 }
  0x1b   :  { %85 = shalt.err (!%p82_p12)
}
  0x1c   :  { %s86_s27 = scalar_lea.hbm %s146_s2, 64 }
  0x1d   :  { %p87_p13 = scmp.ne.s32.totalorder %s146_s2, %s86_s27  ;;  %p90_p0 = scmp.lt.u32.totalorder %s86_s27, %s146_s2 }
  0x1f   :  { %p92_p1 = pnand %p90_p0, %p87_p13 }
  0x21   :  { %95 = shalt.err (!%p92_p1)
}
  0x22   :  { %43 = dma.vmem_to_hbm [thread:$0]  %s41_s22, 64, %s146_s2, [#allocation4]  }
  0x23   :  { %98 = dma.done.wait [#allocation4], 64  }
  0x24   :  { %99 = vsyncadd [#allocation4], 4294967232 }
  0x25   :  { %47 = vsyncpa [#allocation3], 1 }
  0x26   :  { %48 = vsyncpa [#allocation4], 1 }

</bundles_post_ra>
